<compile_context>
chip_gen: v5e
topology: v5e:2x2
jax: 0.10.0
libtpu: 0.0.40
codegen_flags: <defaults>
</compile_context>

<pallas_src>
import jax
import jax.numpy as jnp
from jax.experimental import pallas as pl
from jax.experimental.pallas import tpu as pltpu


def _round_up(n, m):
    return ((n + m - 1) // m) * m


def _round_down(n, m):
    return (n // m) * m


def _pick_pack(b):
    # Largest power-of-two pack factor (rows per sublane row) that divides B.
    for p in (64, 32, 16, 8, 4, 2):
        if b % p == 0:
            return p
    return 1


def _block_diag(w, p):
    # [d_in, d_out] -> block-diagonal [p*d_in, p*d_out]; keeps packed rows independent.
    d_in, d_out = w.shape
    eye = jnp.eye(p, dtype=w.dtype)
    return jnp.einsum("pq,io->piqo", eye, w).reshape(p * d_in, p * d_out)


def simplenet_kernel(x_ref, w1_ref, b1_ref, w2_ref, b2_ref, o_ref):
    # Packed native layout (batch on sublanes, P batch rows per sublane row):
    #   x_ref : [tbr, 10*P]   w1_ref: [10*P, 5*P] (block-diag)   b1_ref: [1, 5*P]
    #   w2_ref: [5*P, 2*P]    b2_ref: [1, 2*P]                   o_ref : [tbr, 2*P]
    h = jnp.dot(x_ref[...], w1_ref[...], preferred_element_type=jnp.float32)
    h = jnp.maximum(h + b1_ref[...], 0.0)                       # bias + ReLU in f32
    y = jnp.dot(h, w2_ref[...], preferred_element_type=jnp.float32)
    o_ref[...] = (y + b2_ref[...]).astype(o_ref.dtype)


@jax.jit
def simplenet_forward(x, w1, b1, w2, b2):
    """x: [B, 10], w1: [10, 5], b1: [5], w2: [5, 2], b2: [2] -> [B, 2]."""
    B, d_in = x.shape
    d_hidden = w1.shape[1]
    d_out = w2.shape[1]
    out_dtype = x.dtype

    P = _pick_pack(B)
    rows = B // P                    # packed rows
    in_w = d_in * P                  # 10*P
    hid_w = d_hidden * P             # 5*P
    out_w = d_out * P                # 2*P

    # Copy-less relayout: contiguous row-major reshape only (no transpose, no zero-pad).
    xp = x.reshape(rows, in_w)

    w1b = _block_diag(w1, P)                                   # [10P, 5P]
    w2b = _block_diag(w2, P)                                   # [5P, 2P]
    b1b = jnp.tile(b1, P).reshape(1, hid_w).astype(jnp.float32)
    b2b = jnp.tile(b2, P).reshape(1, out_w).astype(jnp.float32)

    # Tile rows: cap the x block at ~2 MiB VMEM (minor dim pads to a multiple of 128
    # lanes in VMEM), keep >=2 grid steps when there is enough work (v7x megacore),
    # and never pad the batch (cdiv grid + partial edge block instead).
    bytes_per_packed_row = 4 * _round_up(in_w, 128)
    tbr_cap = max(8, _round_down((2 << 20) // bytes_per_packed_row, 8))
    if rows >= 16:
        tbr = min(tbr_cap, _round_up(-(-rows // 2), 8))
    else:
        tbr = rows                                             # single full block
    grid = (pl.cdiv(rows, tbr),)

    itemsize = jnp.dtype(out_dtype).itemsize
    cost = pl.CostEstimate(
        flops=2 * B * d_in * d_hidden + 2 * B * d_hidden * d_out,
        transcendentals=0,
        bytes_accessed=(B * d_in * itemsize + B * d_out * itemsize
                        + 4 * (w1b.size + w2b.size + b1b.size + b2b.size)),
    )

    yp = pl.pallas_call(
        simplenet_kernel,
        out_shape=jax.ShapeDtypeStruct((rows, out_w), out_dtype),
        grid=grid,
        in_specs=[
            pl.BlockSpec((tbr, in_w), lambda i: (i, 0)),        # x tiles follow batch grid
            pl.BlockSpec((d_in * P, d_hidden * P), lambda i: (0, 0)),   # weights stay resident
            pl.BlockSpec((1, hid_w), lambda i: (0, 0)),
            pl.BlockSpec((d_hidden * P, d_out * P), lambda i: (0, 0)),
            pl.BlockSpec((1, out_w), lambda i: (0, 0)),
        ],
        out_specs=pl.BlockSpec((tbr, out_w), lambda i: (i, 0)),
        compiler_params=pltpu.CompilerParams(
            dimension_semantics=("parallel",),                  # v7x: shard batch over 2 TCs
            vmem_limit_bytes=32 * 1024 * 1024,
        ),
        cost_estimate=cost,
    )(xp, w1b, b1b, w2b, b2b)

    # Copy-less contiguous reshape back to the PyTorch-facing layout [B, 2].
    return yp.reshape(B, d_out)


def init_params(key):
    # Deterministic init mimicking nn.Linear default: U(-1/sqrt(fan_in), 1/sqrt(fan_in)).
    k1, k2, k3, k4 = jax.random.split(key, 4)
    bound1 = 1.0 / jnp.sqrt(10.0)
    bound2 = 1.0 / jnp.sqrt(5.0)
    # Weights stored as [in, out] so reference math is x @ W (== torch's x @ W.T).
    w1 = jax.random.uniform(k1, (10, 5), jnp.float32, -bound1, bound1)
    b1 = jax.random.uniform(k2, (5,), jnp.float32, -bound1, bound1)
    w2 = jax.random.uniform(k3, (5, 2), jnp.float32, -bound2, bound2)
    b2 = jax.random.uniform(k4, (2,), jnp.float32, -bound2, bound2)
    return w1, b1, w2, b2


def _ref(x, w1, b1, w2, b2):
    return jnp.maximum(x @ w1 + b1, 0.0) @ w2 + b2


if __name__ == "__main__":
    key = jax.random.PRNGKey(0)
    kx, kp = jax.random.split(key)
    w1, b1, w2, b2 = init_params(kp)

    # Primary small case (matches the module's tiny MLP spec).
    B = 8
    x = jax.random.normal(kx, (B, 10), jnp.float32)
    out = simplenet_forward(x, w1, b1, w2, b2)
    jax.block_until_ready(out)
    assert out.shape == (B, 2) and out.dtype == x.dtype
    assert jnp.allclose(out, _ref(x, w1, b1, w2, b2), atol=1e-5, rtol=1e-5)

    # Exercise the adaptive paths: different pack factors, multi-step grid, edge block.
    for b_extra in (12, 7, 2048, 1000):
        xe = jax.random.normal(jax.random.PRNGKey(b_extra), (b_extra, 10), jnp.float32)
        oe = simplenet_forward(xe, w1, b1, w2, b2)
        jax.block_until_ready(oe)
        assert oe.shape == (b_extra, 2)
        assert jnp.allclose(oe, _ref(xe, w1, b1, w2, b2), atol=1e-5, rtol=1e-5)

    # TODO(synk): print_tensor_memory in the PyTorch module is host-side logging only;
    # it has no device-kernel equivalent and is intentionally not emulated.
    print("KERNEL_OK")
</pallas_src>

<mosaic_0001>
module attributes {stable_mosaic.version = 11 : i64} {
  func.func @simplenet_kernel(%arg0: i32, %arg1: memref<1x80xf32, #tpu.memory_space<vmem>>, %arg2: memref<80x40xf32, #tpu.memory_space<vmem>>, %arg3: memref<1x40xf32, #tpu.memory_space<vmem>>, %arg4: memref<40x16xf32, #tpu.memory_space<vmem>>, %arg5: memref<1x16xf32, #tpu.memory_space<vmem>>, %arg6: memref<1x16xf32, #tpu.memory_space<vmem>>) attributes {dimension_semantics = [#tpu.dimension_semantics<parallel>], iteration_bounds = array<i64: 1>, scalar_prefetch = 0 : i64, scratch_operands = 0 : i64, tpu.core_type = #tpu.core_type<tc>, window_params = [{transform_indices = @transform_0, window_bounds = array<i64: 1, 80>}, {pipeline_mode = #tpu.pipeline_mode<synchronous>, transform_indices = @transform_1, window_bounds = array<i64: 80, 40>}, {pipeline_mode = #tpu.pipeline_mode<synchronous>, transform_indices = @transform_2, window_bounds = array<i64: 1, 40>}, {pipeline_mode = #tpu.pipeline_mode<synchronous>, transform_indices = @transform_3, window_bounds = array<i64: 40, 16>}, {pipeline_mode = #tpu.pipeline_mode<synchronous>, transform_indices = @transform_4, window_bounds = array<i64: 1, 16>}, {transform_indices = @transform_5, window_bounds = array<i64: 1, 16>}]} {
    %c0 = arith.constant 0 : index
    %c0_0 = arith.constant 0 : index
    %0 = vector.load %arg1[%c0, %c0_0] : memref<1x80xf32, #tpu.memory_space<vmem>>, vector<1x80xf32>
    %c0_1 = arith.constant 0 : index
    %c0_2 = arith.constant 0 : index
    %1 = vector.load %arg2[%c0_1, %c0_2] : memref<80x40xf32, #tpu.memory_space<vmem>>, vector<80x40xf32>
    %cst = arith.constant dense<0.000000e+00> : vector<1x40xf32>
    %2 = tpu.matmul %0, %1, %cst {dimension_numbers = #tpu.dot_dimension_numbers<[1], [0], [0], [1], [0, 0, 1, 1], [], []>} : vector<1x80xf32>, vector<80x40xf32>, vector<1x40xf32> -> vector<1x40xf32>
    %c0_3 = arith.constant 0 : index
    %c0_4 = arith.constant 0 : index
    %3 = vector.load %arg3[%c0_3, %c0_4] : memref<1x40xf32, #tpu.memory_space<vmem>>, vector<1x40xf32>
    %4 = arith.addf %2, %3 : vector<1x40xf32>
    %cst_5 = arith.constant 0.000000e+00 : f32
    %5 = vector.broadcast %cst_5 : f32 to vector<1x40xf32>
    %6 = arith.maximumf %4, %5 : vector<1x40xf32>
    %c0_6 = arith.constant 0 : index
    %c0_7 = arith.constant 0 : index
    %7 = vector.load %arg4[%c0_6, %c0_7] : memref<40x16xf32, #tpu.memory_space<vmem>>, vector<40x16xf32>
    %cst_8 = arith.constant dense<0.000000e+00> : vector<1x16xf32>
    %8 = tpu.matmul %6, %7, %cst_8 {dimension_numbers = #tpu.dot_dimension_numbers<[1], [0], [0], [1], [0, 0, 1, 1], [], []>} : vector<1x40xf32>, vector<40x16xf32>, vector<1x16xf32> -> vector<1x16xf32>
    %c0_9 = arith.constant 0 : index
    %c0_10 = arith.constant 0 : index
    %9 = vector.load %arg5[%c0_9, %c0_10] : memref<1x16xf32, #tpu.memory_space<vmem>>, vector<1x16xf32>
    %10 = arith.addf %8, %9 : vector<1x16xf32>
    %c0_11 = arith.constant 0 : index
    %c0_12 = arith.constant 0 : index
    %11 = vector.load %arg6[%c0_11, %c0_12] : memref<1x16xf32, #tpu.memory_space<vmem>>, vector<1x16xf32>
    tpu.vector_store %arg6[%c0_11, %c0_12], %10 {strides = array<i32>} : memref<1x16xf32, #tpu.memory_space<vmem>>, vector<1x16xf32>,
    return
  }
  func.func @transform_0(%arg0: i32) -> (i32, i32) {
    %c0_i32 = arith.constant 0 : i32
    %c0_i32_0 = arith.constant 0 : i32
    return %arg0, %c0_i32 : i32, i32
  }
  func.func @transform_1(%arg0: i32) -> (i32, i32) {
    %c0_i32 = arith.constant 0 : i32
    %c0_i32_0 = arith.constant 0 : i32
    %c0_i32_1 = arith.constant 0 : i32
    return %c0_i32, %c0_i32_0 : i32, i32
  }
  func.func @transform_2(%arg0: i32) -> (i32, i32) {
    %c0_i32 = arith.constant 0 : i32
    %c0_i32_0 = arith.constant 0 : i32
    %c0_i32_1 = arith.constant 0 : i32
    return %c0_i32, %c0_i32_0 : i32, i32
  }
  func.func @transform_3(%arg0: i32) -> (i32, i32) {
    %c0_i32 = arith.constant 0 : i32
    %c0_i32_0 = arith.constant 0 : i32
    %c0_i32_1 = arith.constant 0 : i32
    return %c0_i32, %c0_i32_0 : i32, i32
  }
  func.func @transform_4(%arg0: i32) -> (i32, i32) {
    %c0_i32 = arith.constant 0 : i32
    %c0_i32_0 = arith.constant 0 : i32
    %c0_i32_1 = arith.constant 0 : i32
    return %c0_i32, %c0_i32_0 : i32, i32
  }
  func.func @transform_5(%arg0: i32) -> (i32, i32) {
    %c0_i32 = arith.constant 0 : i32
    %c0_i32_0 = arith.constant 0 : i32
    return %arg0, %c0_i32 : i32, i32
  }
}

</mosaic_0001>

<bundles_post_ra>
// kernel: tile.14
= control target key start
LH: loop header
LB: loop body
LE: loop exit
PB: predicated region body
PF: predicated region fallthrough
CT: control target
= control target key end

     0   :  { %s67_s10 = smov 35   ;;  %s68_s11 = smov 25   ;;  %vm3_vm0 = vcmask 39936   ;;  %vm9_vm1 = vcmask 326936   ;;  %vm15_vm2 = vcmask 285936   ;;  %vm21_vm3 = vcmask 244936   ;;  %s111_s0 = inlined_call_operand.vmem [shape: f32[8,5], index: 0, kind: input, shape index: {}]   ;;  %s112_s1 = inlined_call_operand.vmem [shape: f32[1,40], index: 1, kind: output, shape index: {}]  }
   0x1   :  { %v53_v0 = vld [vmem:[%s111_s0 + $0x7] sm:$0x1]   ;;  %v55_v1 = vld [vmem:[%s111_s0 + $0x5] sm:$0x1]   ;;  %v57_v2 = vld [vmem:[%s111_s0 + $0x3] sm:$0x1]  }
   0x2   :  { %7 = vrot.lane.b32.xlu0 %v53_v0, %s67_s10  ;;  %19 = vrot.lane.b32.xlu1 %v55_v1, %s68_s11  ;;  %s69_s14 = smov 15   ;;  %v54_v3 = vld [vmem:[%s111_s0 + $0x6] sm:$0x1]   ;;  %v56_v4 = vld [vmem:[%s111_s0 + $0x4] sm:$0x1]   ;;  %s70_s21 = smov 30  }
   0x3   :  { %31 = vrot.lane.b32.xlu2 %v57_v2, %s69_s14  ;;  %v58_v5 = vld [vmem:[%s111_s0 + $0x2] sm:$0x1]   ;;  %s71_s22 = smov 20   ;;  %s72_s23 = smov 10   ;;  %v59_v6 = vld [vmem:[%s111_s0 + $0x1] sm:$0x1]  }
   0x4   :  { %s73_s26 = smov 5   ;;  %v2_v7 = vld [vmem:[%s111_s0] sm:$0x1]   ;;  %vm27_vm4 = vcmask 203936   ;;  %vm33_vm5 = vcmask 162936   ;;  %vm39_vm6 = vcmask 121936  }
   0x5   :  { %4 = vst.msk [vmem:[#allocation0] sm:$0x1] %vm3_vm0, %v2_v7   ;;  %vm45_vm7 = vcmask 80936  }
   0xa   :  { %13 = vrot.lane.b32.xlu0 %v54_v3, %s70_s21  ;;  %25 = vrot.lane.b32.xlu1 %v56_v4, %s71_s22 }
   0xb   :  { %37 = vrot.lane.b32.xlu2 %v58_v5, %s72_s23 }
  0x12   :  { %43 = vrot.lane.b32.xlu0 %v59_v6, %s73_s26 }
  0x5d   :  { %v32_v8 = vpop.permute.xlu2 %31  }
  0x65   :  { %v38_v9 = vpop.permute.xlu2 %37  }
  0x74   :  { %v8_v10 = vpop.permute.xlu0 %7   ;;  %v20_v11 = vpop.permute.xlu1 %19  }
  0x75   :  { %10 = vst.msk [vmem:[#allocation0] sm:$0x1] %vm9_vm1, %v8_v10  }
  0x7c   :  { %v14_v12 = vpop.permute.xlu0 %13   ;;  %v26_v13 = vpop.permute.xlu1 %25  }
  0x7d   :  { %16 = vst.msk [vmem:[#allocation0] sm:$0x1] %vm15_vm2, %v14_v12  }
  0x7e   :  { %22 = vst.msk [vmem:[#allocation0] sm:$0x1] %vm21_vm3, %v20_v11  }
  0x7f   :  { %28 = vst.msk [vmem:[#allocation0] sm:$0x1] %vm27_vm4, %v26_v13  }
  0x80   :  { %34 = vst.msk [vmem:[#allocation0] sm:$0x1] %vm33_vm5, %v32_v8  }
  0x81   :  { %40 = vst.msk [vmem:[#allocation0] sm:$0x1] %vm39_vm6, %v38_v9  }
  0x84   :  { %v44_v14 = vpop.permute.xlu0 %43  }
  0x85   :  { %46 = vst.msk [vmem:[#allocation0] sm:$0x1] %vm45_vm7, %v44_v14  }
  0x8c   :  { %v49_v15 = vld [vmem:[#allocation0] sm:$0x1] }
  0x8d   :  { %52 = vst [vmem:[%s112_s1] sm:$0x1] %v49_v15 }

// kernel: tile.13
= control target key start
LH: loop header
LB: loop body
LE: loop exit
PB: predicated region body
PF: predicated region fallthrough
CT: control target
= control target key end

     0   :  { %s22_s0 = inlined_call_operand.vmem [shape: f32[5], index: 0, kind: input, shape index: {}]   ;;  %s23_s1 = inlined_call_operand.vmem [shape: f32[8,5], index: 1, kind: output, shape index: {}]  }
   0x1   :  { %v4_v0 = vld [vmem:[%s22_s0] ss:$0 sm:$0xff] }
   0x2   :  { %5 = vst [vmem:[%s23_s1] sm:$0xff] %v4_v0 }

// kernel: tile.18
= control target key start
LH: loop header
LB: loop body
LE: loop exit
PB: predicated region body
PF: predicated region fallthrough
CT: control target
= control target key end

     0   :  { %s22_s0 = inlined_call_operand.vmem [shape: f32[2], index: 0, kind: input, shape index: {}]   ;;  %s23_s1 = inlined_call_operand.vmem [shape: f32[8,2], index: 1, kind: output, shape index: {}]  }
   0x1   :  { %v4_v0 = vld [vmem:[%s22_s0] ss:$0 sm:$0xff] }
   0x2   :  { %5 = vst [vmem:[%s23_s1] sm:$0xff] %v4_v0 }

// kernel: tile.19
= control target key start
LH: loop header
LB: loop body
LE: loop exit
PB: predicated region body
PF: predicated region fallthrough
CT: control target
= control target key end

     0   :  { %s67_s10 = smov 14   ;;  %s68_s11 = smov 10   ;;  %vm3_vm0 = vcmask 15360   ;;  %vm9_vm1 = vcmask 130160   ;;  %vm15_vm2 = vcmask 113760   ;;  %vm21_vm3 = vcmask 97360   ;;  %s111_s0 = inlined_call_operand.vmem [shape: f32[8,2], index: 0, kind: input, shape index: {}]   ;;  %s112_s1 = inlined_call_operand.vmem [shape: f32[1,16], index: 1, kind: output, shape index: {}]  }
   0x1   :  { %v53_v0 = vld [vmem:[%s111_s0 + $0x7] sm:$0x1]   ;;  %v55_v1 = vld [vmem:[%s111_s0 + $0x5] sm:$0x1]   ;;  %v57_v2 = vld [vmem:[%s111_s0 + $0x3] sm:$0x1]  }
   0x2   :  { %7 = vrot.lane.b32.xlu0 %v53_v0, %s67_s10  ;;  %19 = vrot.lane.b32.xlu1 %v55_v1, %s68_s11  ;;  %s69_s14 = smov 6   ;;  %v54_v3 = vld [vmem:[%s111_s0 + $0x6] sm:$0x1]   ;;  %v56_v4 = vld [vmem:[%s111_s0 + $0x4] sm:$0x1]   ;;  %s70_s21 = smov 12  }
   0x3   :  { %31 = vrot.lane.b32.xlu2 %v57_v2, %s69_s14  ;;  %v58_v5 = vld [vmem:[%s111_s0 + $0x2] sm:$0x1]   ;;  %s71_s22 = smov 8   ;;  %s72_s23 = smov 4   ;;  %v59_v6 = vld [vmem:[%s111_s0 + $0x1] sm:$0x1]  }
   0x4   :  { %s73_s26 = smov 2   ;;  %v2_v7 = vld [vmem:[%s111_s0] sm:$0x1]   ;;  %vm27_vm4 = vcmask 80960   ;;  %vm33_vm5 = vcmask 64560   ;;  %vm39_vm6 = vcmask 48160  }
   0x5   :  { %4 = vst.msk [vmem:[#allocation0] sm:$0x1] %vm3_vm0, %v2_v7   ;;  %vm45_vm7 = vcmask 31760  }
   0xa   :  { %13 = vrot.lane.b32.xlu0 %v54_v3, %s70_s21  ;;  %25 = vrot.lane.b32.xlu1 %v56_v4, %s71_s22 }
   0xb   :  { %37 = vrot.lane.b32.xlu2 %v58_v5, %s72_s23 }
  0x12   :  { %43 = vrot.lane.b32.xlu0 %v59_v6, %s73_s26 }
  0x5d   :  { %v32_v8 = vpop.permute.xlu2 %31  }
  0x65   :  { %v38_v9 = vpop.permute.xlu2 %37  }
  0x74   :  { %v8_v10 = vpop.permute.xlu0 %7   ;;  %v20_v11 = vpop.permute.xlu1 %19  }
  0x75   :  { %10 = vst.msk [vmem:[#allocation0] sm:$0x1] %vm9_vm1, %v8_v10  }
  0x7c   :  { %v14_v12 = vpop.permute.xlu0 %13   ;;  %v26_v13 = vpop.permute.xlu1 %25  }
  0x7d   :  { %16 = vst.msk [vmem:[#allocation0] sm:$0x1] %vm15_vm2, %v14_v12  }
  0x7e   :  { %22 = vst.msk [vmem:[#allocation0] sm:$0x1] %vm21_vm3, %v20_v11  }
  0x7f   :  { %28 = vst.msk [vmem:[#allocation0] sm:$0x1] %vm27_vm4, %v26_v13  }
  0x80   :  { %34 = vst.msk [vmem:[#allocation0] sm:$0x1] %vm33_vm5, %v32_v8  }
  0x81   :  { %40 = vst.msk [vmem:[#allocation0] sm:$0x1] %vm39_vm6, %v38_v9  }
  0x84   :  { %v44_v14 = vpop.permute.xlu0 %43  }
  0x85   :  { %46 = vst.msk [vmem:[#allocation0] sm:$0x1] %vm45_vm7, %v44_v14  }
  0x8c   :  { %v49_v15 = vld [vmem:[#allocation0] sm:$0x1] }
  0x8d   :  { %52 = vst [vmem:[%s112_s1] sm:$0x1] %v49_v15 }

// kernel: simplenet_forward.1
= control target key start
LH: loop header
LB: loop body
LE: loop exit
PB: predicated region body
PF: predicated region fallthrough
CT: control target
= control target key end

     0   :  { %vm32_vm0 = vcmask 654336   ;;  %vm63_vm1 = vcmask 326656   ;;  %vm87_vm2 = vcmask 122880   ;;  %s182_s1 = inlined_call_operand.vmem [shape: f32[80,40], index: 1, kind: input, shape index: {}]   ;;  %s183_s3 = inlined_call_operand.vmem [shape: f32[40,16], index: 3, kind: input, shape index: {}]   ;;  %s184_s0 = inlined_call_operand.vmem [shape: f32[1,80], index: 0, kind: input, shape index: {}]   ;;  %s185_s2 = inlined_call_operand.vmem [shape: f32[1,40], index: 2, kind: input, shape index: {}]   ;;  %s186_s4 = inlined_call_operand.vmem [shape: f32[1,16], index: 4, kind: input, shape index: {}]   ;;  %s187_s5 = inlined_call_operand.vmem [shape: f32[1,16], index: 5, kind: output, shape index: {}]  }
   0x1   :  { %v30_v0 = vld [vmem:[%s182_s1 + $0x48] sm:$0xff]  ;;  %v29_v1 = vld [vmem:[%s182_s1 + $0x40] sm:$0xff]  ;;  %v28_v2 = vld [vmem:[%s182_s1 + $0x38] sm:$0xff] }
   0x2   :  { %42 = vmatpush.msra.mxu0 %v30_v0  ;;  %v61_v3 = vld [vmem:[%s183_s3 + $0x20] sm:$0xff]  ;;  %v27_v4 = vld [vmem:[%s182_s1 + $0x30] sm:$0xff]  ;;  %v60_v5 = vld [vmem:[%s183_s3 + $0x18] sm:$0xff] }
   0x3   :  { %78 = vmatpush.msra.mxu1 %v61_v3  ;;  %v26_v6 = vld [vmem:[%s182_s1 + $0x28] sm:$0xff]  ;;  %v25_v7 = vld [vmem:[%s182_s1 + $0x20] sm:$0xff]  ;;  %v24_v8 = vld [vmem:[%s182_s1 + $0x18] sm:$0xff] }
   0x4   :  { %43 = vmatpush.msra.mxu0 %v29_v1  ;;  %v23_v9 = vld [vmem:[%s182_s1 + $0x10] sm:$0xff]  ;;  %v22_v10 = vld [vmem:[%s182_s1 + $0x8] sm:$0xff]  ;;  %v21_v11 = vld [vmem:[%s182_s1] sm:$0xff] }
   0x5   :  { %79 = vmatpush.msra.mxu1 %v60_v5  ;;  %v20_v12 = vld [vmem:[%s184_s0] sm:$0x1]  ;;  %v59_v13 = vld [vmem:[%s183_s3 + $0x10] sm:$0xff]  ;;  %v58_v14 = vld [vmem:[%s183_s3 + $0x8] sm:$0xff] }
   0x6   :  { %44 = vmatpush.msra.mxu0 %v28_v2  ;;  %v57_v15 = vld [vmem:[%s183_s3] sm:$0xff] }
   0x7   :  { %80 = vmatpush.msra.mxu1 %v59_v13  ;;  %v31_v16 = vld [vmem:[%s185_s2] sm:$0x1] }
   0x8   :  { %45 = vmatpush.msra.mxu0 %v27_v4  ;;  %v62_v20 = vld [vmem:[%s186_s4] sm:$0x1] }
   0x9   :  { %81 = vmatpush.msra.mxu1 %v58_v14 }
   0xa   :  { %46 = vmatpush.msra.mxu0 %v26_v6 }
   0xb   :  { %82 = vmatpush.msra.mxu1 %v57_v15 }
   0xc   :  { %47 = vmatpush.msra.mxu0 %v25_v7 }
   0xe   :  { %48 = vmatpush.msra.mxu0 %v24_v8 }
  0x10   :  { %49 = vmatpush.msra.mxu0 %v23_v9 }
  0x12   :  { %50 = vmatpush.msra.mxu0 %v22_v10 }
  0x14   :  { %51 = vmatpush.msra.mxu0 %v21_v11 }
  0x15   :  { %93 = vmatmul.msk.f32.vlgmr.msra.gmra.mxu0 %vm32_vm0, %v20_v12 }
  0x92   :  { %v53_v17 = vpop.f32.mrf.mxu0 }
  0x93   :  { %v54_v18 = vadd.f32 %v53_v17, %v31_v16 }
  0x95   :  { %v56_v19 = vmax.f32 %v54_v18, 0.0 }
  0x97   :  { %94 = vmatmul.msk.f32.vlgmr.msra.gmra.mxu1 %vm63_vm1, %v56_v19 }
 0x114   :  { %v84_v21 = vpop.f32.mrf.mxu1 }
 0x115   :  { %v85_v22 = vadd.f32 %v84_v21, %v62_v20 }
 0x117   :  { %88 = vst.msk [vmem:[%s187_s5] sm:$0x1] %vm87_vm2, %v85_v22 }

</bundles_post_ra>
